<compile_context>
chip_gen: v7x
topology: tpu7x:2x2x1
jax: 0.10.0
libtpu: 0.0.40
codegen_flags: <defaults>
</compile_context>

<pallas_src>
import functools

import jax
import jax.numpy as jnp
from jax import lax
from jax.experimental import pallas as pl
from jax.experimental.pallas import tpu as pltpu


_NEG_INF = -1e30


def _round_up(x: int, m: int) -> int:
    return (x + m - 1) // m * m


def coattention_kernel(dx_ref, qx_ref, out_ref, *, m1, n1, operand_dtype):
    """One batch-block of DCN coattention, fully in VMEM.

    dx_ref : (Bblk, n1p, hp)    context encodings + sentinel row (zero padded)
    qx_ref : (Bblk, m1p, hp)    tanh-projected question + sentinel (zero padded)
    out_ref: (Bblk, n1p, 2*hp)  C_D^T = [A_D^T @ Qx | A_D^T @ C_Q^T]
    """
    f32 = jnp.float32
    dx = dx_ref[...]
    qx = qx_ref[...]
    _, n1p, hp = dx.shape
    _, m1p, _ = qx.shape

    # Affinity matrix in both layouts (two small MXU matmuls -> keeps every
    # later contraction transpose-free). l_qd[b,i,j] = l_dq[b,j,i] = Q_i . D_j
    l_qd = jnp.einsum("bmh,bnh->bmn", qx, dx, preferred_element_type=f32)
    l_dq = jnp.einsum("bnh,bmh->bnm", dx, qx, preferred_element_type=f32)

    # Mask the artificial sequence padding (compile-time-static pattern,
    # batch-broadcast masks keep vreg pressure low).
    if m1p > m1 or n1p > n1:
        qi = lax.broadcasted_iota(jnp.int32, (1, m1p, n1p), 1)
        ci = lax.broadcasted_iota(jnp.int32, (1, m1p, n1p), 2)
        l_qd = jnp.where((qi < m1) & (ci < n1), l_qd, _NEG_INF)
        cit = lax.broadcasted_iota(jnp.int32, (1, n1p, m1p), 1)
        qit = lax.broadcasted_iota(jnp.int32, (1, n1p, m1p), 2)
        l_dq = jnp.where((cit < n1) & (qit < m1), l_dq, _NEG_INF)

    # Shared per-batch stabilizer (exact softmax, overflow-free, one reduce).
    gmax = jnp.max(jnp.max(l_qd, axis=2, keepdims=True), axis=1, keepdims=True)
    e_qd = jnp.exp(l_qd - gmax)                  # (b, m1p, n1p), padded -> 0
    e_dq = jnp.exp(l_dq - gmax)                  # (b, n1p, m1p), padded -> 0

    # A_Q  : softmax over the question axis, kept in (b, m, n) layout.
    # A_D^T: softmax over the context  axis, kept in (b, n, m) layout.
    col_sum = jnp.maximum(jnp.sum(e_qd, axis=1, keepdims=True), 1e-30)  # (b,1,n)
    row_sum = jnp.maximum(jnp.sum(e_dq, axis=1, keepdims=True), 1e-30)  # (b,1,m)
    a_q = (e_qd * pl.reciprocal(col_sum, approx=True)).astype(operand_dtype)
    a_dt = (e_dq * pl.reciprocal(row_sum, approx=True)).astype(operand_dtype)

    # C_Q^T = A_Q @ Dx                                    (b, m1p, hp)
    c_qt = jnp.einsum("bmn,bnh->bmh", a_q, dx, preferred_element_type=f32)

    # C_D^T = A_D^T @ [Qx | C_Q^T] -> two halves, stored straight into the
    # lane-dense output block (no concat, no [:-1] slice, 128-aligned stores).
    cd_q = jnp.einsum("bnm,bmh->bnh", a_dt, qx, preferred_element_type=f32)
    cd_c = jnp.einsum("bnm,bmh->bnh", a_dt, c_qt.astype(operand_dtype),
                      preferred_element_type=f32)
    out_ref[:, :, :hp] = cd_q.astype(out_ref.dtype)
    out_ref[:, :, hp:] = cd_c.astype(out_ref.dtype)


def coattention(D, Q, w_proj, b_proj, sentinel_c, sentinel_q, *,
                operand_dtype=jnp.bfloat16, block_b=None):
    """D: (B, n, h), Q: (B, m, h) -> temporal_info: (B, n, 3h) float32."""
    f32 = jnp.float32
    B, n, h = D.shape
    _, m, _ = Q.shape
    D = D.astype(f32)
    Q = Q.astype(f32)

    # Hoisted question projection: one XLA matmul over the whole batch instead
    # of a tiny per-grid-step matmul inside the kernel.
    Qp = jnp.tanh(jnp.einsum("bmh,oh->bmo", Q, w_proj.astype(f32))
                  + b_proj.reshape(1, 1, h).astype(f32))

    # Sentinel rows appended wrapper-side (layout-clean, amortized by XLA).
    sc = jnp.broadcast_to(sentinel_c.reshape(1, 1, h).astype(f32), (B, 1, h))
    sq = jnp.broadcast_to(sentinel_q.reshape(1, 1, h).astype(f32), (B, 1, h))
    Dx = jnp.concatenate([D, sc], axis=1)          # (B, n+1, h)
    Qx = jnp.concatenate([Qp, sq], axis=1)         # (B, m+1, h)

    n1, m1 = n + 1, m + 1
    hp = _round_up(h, 128)       # lane-dense hidden
    n1p = _round_up(n1, 8)       # sublane-aligned sequence dims
    m1p = _round_up(m1, 8)

    # Zero-pad and cast the matmul operands (bf16 by default: MXU-friendly and
    # halves HBM->VMEM traffic; accumulation stays f32 inside the kernel).
    Dx = jnp.pad(Dx, ((0, 0), (0, n1p - n1), (0, hp - h))).astype(operand_dtype)
    Qx = jnp.pad(Qx, ((0, 0), (0, m1p - m1), (0, hp - h))).astype(operand_dtype)

    # VMEM-aware batch-block sizing (v7x: 64 MiB physical / 32 MiB scoped).
    in_bytes = jnp.dtype(operand_dtype).itemsize
    per_b = (2 * ((n1p + m1p) * hp * in_bytes + n1p * 2 * hp * 4)   # dbl-buffered I/O
             + (6 * m1p * n1p + 3 * max(m1p, n1p) * hp) * 4)        # f32 intermediates
    if block_b is None:
        block_b = max(1, min(B, (12 * 2 ** 20) // per_b, 32))
        if B >= 2:  # keep >=2 "parallel" grid steps so both v7x TCs get work
            block_b = min(block_b, (B + 1) // 2)
    num_blocks = pl.cdiv(B, block_b)
    Bp = num_blocks * block_b
    if Bp != B:
        Dx = jnp.pad(Dx, ((0, Bp - B), (0, 0), (0, 0)))
        Qx = jnp.pad(Qx, ((0, Bp - B), (0, 0), (0, 0)))

    kernel = functools.partial(coattention_kernel, m1=m1, n1=n1,
                               operand_dtype=operand_dtype)
    grid_spec = pltpu.PrefetchScalarGridSpec(
        num_scalar_prefetch=0,
        grid=(num_blocks,),
        in_specs=[
            pl.BlockSpec((block_b, n1p, hp), lambda b: (b, 0, 0)),     # Dx
            pl.BlockSpec((block_b, m1p, hp), lambda b: (b, 0, 0)),     # Qx
        ],
        out_specs=pl.BlockSpec((block_b, n1p, 2 * hp), lambda b: (b, 0, 0)),
    )
    vmem_limit = int(min(32 * 2 ** 20, max(16 * 2 ** 20, 2 * block_b * per_b)))
    cd = pl.pallas_call(
        kernel,
        out_shape=jax.ShapeDtypeStruct((Bp, n1p, 2 * hp), f32),
        grid_spec=grid_spec,
        compiler_params=pltpu.CompilerParams(
            dimension_semantics=("parallel",),
            vmem_limit_bytes=vmem_limit,
        ),
    )(Dx, Qx)

    # temporal_info = [D | C_D^T]; its first h columns are exactly D, and the
    # kernel's two 128-aligned halves carry the valid C_D^T columns.
    cd = cd[:B, :n, :]
    return jnp.concatenate([D, cd[..., :h], cd[..., hp:hp + h]], axis=-1)


def _reference(D, Q, w_proj, b_proj, sentinel_c, sentinel_q):
    """Plain-JAX (f32) reference mirroring the torch coattention math."""
    B = D.shape[0]
    Qp = jnp.tanh(jnp.einsum("bmh,oh->bmo", Q, w_proj) + b_proj[None])
    sc = jnp.broadcast_to(sentinel_c, (B, 1, sentinel_c.shape[-1]))
    sq = jnp.broadcast_to(sentinel_q, (B, 1, sentinel_q.shape[-1]))
    Dx = jnp.concatenate([D, sc], axis=1)
    Qx = jnp.concatenate([Qp, sq], axis=1)
    D_T = jnp.swapaxes(Dx, 1, 2)
    L = jnp.einsum("bmh,bhn->bmn", Qx, D_T)
    A_Q = jax.nn.softmax(L, axis=1)
    A_Q = jnp.swapaxes(A_Q, 1, 2)
    A_D = jax.nn.softmax(L, axis=2)
    C_Q = jnp.einsum("bhn,bnm->bhm", D_T, A_Q)
    Q_T = jnp.swapaxes(Qx, 1, 2)
    Q_CQ = jnp.concatenate([Q_T, C_Q], axis=1)
    C_D = jnp.einsum("bkm,bmn->bkn", Q_CQ, A_D)
    C_D_T = jnp.swapaxes(C_D, 1, 2)
    temporal = jnp.concatenate([Dx, C_D_T], axis=2)
    return temporal[:, :-1, :]


if __name__ == "__main__":
    key = jax.random.PRNGKey(0)
    ks = jax.random.split(key, 10)

    # Small shapes.
    batch = 2
    context_len = 16
    question_len = 8
    vocab = 50
    embedding_size = 32
    hidden_size = 32

    # Deterministic "word_vectors" + parameters.
    word_vectors = jax.random.normal(ks[0], (vocab, embedding_size), jnp.float32)
    w_proj = jax.random.normal(ks[1], (hidden_size, hidden_size), jnp.float32) * 0.1
    b_proj = jnp.zeros((1, hidden_size), jnp.float32)
    sentinel_c = jax.random.uniform(ks[2], (1, hidden_size), jnp.float32)
    sentinel_q = jax.random.uniform(ks[3], (1, hidden_size), jnp.float32)

    # Word indices (0 = pad).
    cw_idxs = jax.random.randint(ks[4], (batch, context_len), 1, vocab)
    qw_idxs = jax.random.randint(ks[5], (batch, question_len), 1, vocab)

    # Glue: embedding lookup (layers.Embedding stand-in, dropout in eval mode).
    c_emb = jnp.take(word_vectors, cw_idxs, axis=0)   # (B, n, emb)
    q_emb = jnp.take(word_vectors, qw_idxs, axis=0)   # (B, m, emb)

    # TODO(synk): layers.LSTMEncoder is undefined in the prompt; replaced by a
    # deterministic linear projection emb -> hidden as the encoder stand-in.
    w_enc = jax.random.normal(ks[6], (embedding_size, hidden_size), jnp.float32) * 0.1
    D = jnp.tanh(jnp.einsum("bse,eh->bsh", c_emb, w_enc))   # (B, n, h)
    Q = jnp.tanh(jnp.einsum("bse,eh->bsh", q_emb, w_enc))   # (B, m, h)

    # Pallas coattention hot path: optimized (bf16 MXU operands) path.
    temporal_info = coattention(D, Q, w_proj, b_proj, sentinel_c, sentinel_q)
    temporal_info = jax.block_until_ready(temporal_info)

    # Validate against the plain-JAX reference.
    ref = _reference(D, Q, w_proj, b_proj, sentinel_c, sentinel_q)

    # f32-operand path: exercises identical kernel structure; tight tolerance
    # (relaxed only for the approx reciprocal / shared softmax stabilizer).
    temporal_f32 = coattention(D, Q, w_proj, b_proj, sentinel_c, sentinel_q,
                               operand_dtype=jnp.float32)
    temporal_f32 = jax.block_until_ready(temporal_f32)
    assert temporal_info.shape == ref.shape
    assert jnp.allclose(temporal_f32, ref, atol=2e-2, rtol=2e-2), "f32 path mismatch"
    # bf16-operand path: relaxed tolerance for bf16 MXU operand rounding.
    assert jnp.allclose(temporal_info, ref, atol=8e-2, rtol=8e-2), "bf16 path mismatch"

    # TODO(synk): layers.FusionBiLSTM and layers.DynamicDecoder (recurrent
    # fusion + iterative HMN decoding with loss) are undefined in the prompt;
    # not reimplemented here.
    print("KERNEL_OK")
</pallas_src>

<mosaic_0001>
module attributes {stable_mosaic.version = 11 : i64} {
  func.func @coattention_kernel(%arg0: i32, %arg1: memref<1x24x128xbf16, #tpu.memory_space<vmem>>, %arg2: memref<1x16x128xbf16, #tpu.memory_space<vmem>>, %arg3: memref<1x24x256xf32, #tpu.memory_space<vmem>>) attributes {dimension_semantics = [#tpu.dimension_semantics<parallel>], iteration_bounds = array<i64: 2>, scalar_prefetch = 0 : i64, scratch_operands = 0 : i64, tpu.core_type = #tpu.core_type<tc>, window_params = [{transform_indices = @transform_0, window_bounds = array<i64: 1, 24, 128>}, {transform_indices = @transform_1, window_bounds = array<i64: 1, 16, 128>}, {transform_indices = @transform_2, window_bounds = array<i64: 1, 24, 256>}]} {
    %c0 = arith.constant 0 : index
    %c0_0 = arith.constant 0 : index
    %c0_1 = arith.constant 0 : index
    %0 = vector.load %arg1[%c0, %c0_0, %c0_1] : memref<1x24x128xbf16, #tpu.memory_space<vmem>>, vector<1x24x128xbf16>
    %c0_2 = arith.constant 0 : index
    %c0_3 = arith.constant 0 : index
    %c0_4 = arith.constant 0 : index
    %1 = vector.load %arg2[%c0_2, %c0_3, %c0_4] : memref<1x16x128xbf16, #tpu.memory_space<vmem>>, vector<1x16x128xbf16>
    "tpu.trace_start"() <{level = 10 : i32, message = "bmh,bnh->bmn"}> : () -> ()
    %cst = arith.constant dense<0.000000e+00> : vector<1x16x24xf32>
    %2 = tpu.matmul %1, %0, %cst {dimension_numbers = #tpu.dot_dimension_numbers<[2], [2], [1], [1], [0, 0, 0, 1, 1, 1], [0], [0]>} : vector<1x16x128xbf16>, vector<1x24x128xbf16>, vector<1x16x24xf32> -> vector<1x16x24xf32>
    "tpu.trace_stop"() : () -> ()
    "tpu.trace_start"() <{level = 10 : i32, message = "bnh,bmh->bnm"}> : () -> ()
    %cst_5 = arith.constant dense<0.000000e+00> : vector<1x24x16xf32>
    %3 = tpu.matmul %0, %1, %cst_5 {dimension_numbers = #tpu.dot_dimension_numbers<[2], [2], [1], [1], [0, 0, 0, 1, 1, 1], [0], [0]>} : vector<1x24x128xbf16>, vector<1x16x128xbf16>, vector<1x24x16xf32> -> vector<1x24x16xf32>
    "tpu.trace_stop"() : () -> ()
    %4 = tpu.iota {dimensions = array<i32: 1>} : vector<1x16x24xi32>
    %5 = tpu.iota {dimensions = array<i32: 2>} : vector<1x16x24xi32>
    %c9_i32 = arith.constant 9 : i32
    %6 = vector.broadcast %c9_i32 : i32 to vector<1x16x24xi32>
    %7 = arith.cmpi slt, %4, %6 : vector<1x16x24xi32>
    %c17_i32 = arith.constant 17 : i32
    %8 = vector.broadcast %c17_i32 : i32 to vector<1x16x24xi32>
    %9 = arith.cmpi slt, %5, %8 : vector<1x16x24xi32>
    %10 = arith.andi %7, %9 : vector<1x16x24xi1>
    %cst_6 = arith.constant -1.000000e+30 : f32
    %11 = vector.broadcast %cst_6 : f32 to vector<1x16x24xf32>
    %12 = arith.select %10, %2, %11 : vector<1x16x24xi1>, vector<1x16x24xf32>
    %13 = tpu.iota {dimensions = array<i32: 1>} : vector<1x24x16xi32>
    %14 = tpu.iota {dimensions = array<i32: 2>} : vector<1x24x16xi32>
    %c17_i32_7 = arith.constant 17 : i32
    %15 = vector.broadcast %c17_i32_7 : i32 to vector<1x24x16xi32>
    %16 = arith.cmpi slt, %13, %15 : vector<1x24x16xi32>
    %c9_i32_8 = arith.constant 9 : i32
    %17 = vector.broadcast %c9_i32_8 : i32 to vector<1x24x16xi32>
    %18 = arith.cmpi slt, %14, %17 : vector<1x24x16xi32>
    %19 = arith.andi %16, %18 : vector<1x24x16xi1>
    %cst_9 = arith.constant -1.000000e+30 : f32
    %20 = vector.broadcast %cst_9 : f32 to vector<1x24x16xf32>
    %21 = arith.select %19, %3, %20 : vector<1x24x16xi1>, vector<1x24x16xf32>
    %cst_10 = arith.constant dense<0xFF800000> : vector<1x16xf32>
    %22 = vector.multi_reduction <maximumf>, %12, %cst_10 [2] : vector<1x16x24xf32> to vector<1x16xf32>
    %23 = vector.shape_cast %22 : vector<1x16xf32> to vector<1x16x1xf32>
    %cst_11 = arith.constant dense<0xFF800000> : vector<1x1xf32>
    %24 = vector.multi_reduction <maximumf>, %23, %cst_11 [1] : vector<1x16x1xf32> to vector<1x1xf32>
    %25 = vector.shape_cast %24 : vector<1x1xf32> to vector<1x1x1xf32>
    %26 = vector.broadcast %25 : vector<1x1x1xf32> to vector<1x16x24xf32>
    %27 = arith.subf %12, %26 : vector<1x16x24xf32>
    %28 = math.exp %27 : vector<1x16x24xf32>
    %29 = vector.broadcast %25 : vector<1x1x1xf32> to vector<1x24x16xf32>
    %30 = arith.subf %21, %29 : vector<1x24x16xf32>
    %31 = math.exp %30 : vector<1x24x16xf32>
    %cst_12 = arith.constant dense<0.000000e+00> : vector<1x24xf32>
    %32 = vector.multi_reduction <add>, %28, %cst_12 [1] : vector<1x16x24xf32> to vector<1x24xf32>
    %33 = vector.shape_cast %32 : vector<1x24xf32> to vector<1x1x24xf32>
    %cst_13 = arith.constant 1.000000e-30 : f32
    %34 = vector.broadcast %cst_13 : f32 to vector<1x1x24xf32>
    %35 = arith.maximumf %33, %34 : vector<1x1x24xf32>
    %cst_14 = arith.constant dense<0.000000e+00> : vector<1x16xf32>
    %36 = vector.multi_reduction <add>, %31, %cst_14 [1] : vector<1x24x16xf32> to vector<1x16xf32>
    %37 = vector.shape_cast %36 : vector<1x16xf32> to vector<1x1x16xf32>
    %cst_15 = arith.constant 1.000000e-30 : f32
    %38 = vector.broadcast %cst_15 : f32 to vector<1x1x16xf32>
    %39 = arith.maximumf %37, %38 : vector<1x1x16xf32>
    %40 = tpu.reciprocal %35 {approx = true} : vector<1x1x24xf32> -> vector<1x1x24xf32>
    %41 = vector.broadcast %40 : vector<1x1x24xf32> to vector<1x16x24xf32>
    %42 = arith.mulf %28, %41 : vector<1x16x24xf32>
    %43 = arith.truncf %42 : vector<1x16x24xf32> to vector<1x16x24xbf16>
    %44 = tpu.reciprocal %39 {approx = true} : vector<1x1x16xf32> -> vector<1x1x16xf32>
    %45 = vector.broadcast %44 : vector<1x1x16xf32> to vector<1x24x16xf32>
    %46 = arith.mulf %31, %45 : vector<1x24x16xf32>
    %47 = arith.truncf %46 : vector<1x24x16xf32> to vector<1x24x16xbf16>
    "tpu.trace_start"() <{level = 10 : i32, message = "bmn,bnh->bmh"}> : () -> ()
    %cst_16 = arith.constant dense<0.000000e+00> : vector<1x16x128xf32>
    %48 = tpu.matmul %43, %0, %cst_16 {dimension_numbers = #tpu.dot_dimension_numbers<[2], [1], [1], [2], [0, 0, 0, 1, 1, 2], [0], [0]>} : vector<1x16x24xbf16>, vector<1x24x128xbf16>, vector<1x16x128xf32> -> vector<1x16x128xf32>
    "tpu.trace_stop"() : () -> ()
    "tpu.trace_start"() <{level = 10 : i32, message = "bnm,bmh->bnh"}> : () -> ()
    %cst_17 = arith.constant dense<0.000000e+00> : vector<1x24x128xf32>
    %49 = tpu.matmul %47, %1, %cst_17 {dimension_numbers = #tpu.dot_dimension_numbers<[2], [1], [1], [2], [0, 0, 0, 1, 1, 2], [0], [0]>} : vector<1x24x16xbf16>, vector<1x16x128xbf16>, vector<1x24x128xf32> -> vector<1x24x128xf32>
    "tpu.trace_stop"() : () -> ()
    %50 = arith.truncf %48 : vector<1x16x128xf32> to vector<1x16x128xbf16>
    "tpu.trace_start"() <{level = 10 : i32, message = "bnm,bmh->bnh"}> : () -> ()
    %cst_18 = arith.constant dense<0.000000e+00> : vector<1x24x128xf32>
    %51 = tpu.matmul %47, %50, %cst_18 {dimension_numbers = #tpu.dot_dimension_numbers<[2], [1], [1], [2], [0, 0, 0, 1, 1, 2], [0], [0]>} : vector<1x24x16xbf16>, vector<1x16x128xbf16>, vector<1x24x128xf32> -> vector<1x24x128xf32>
    "tpu.trace_stop"() : () -> ()
    %c0_19 = arith.constant 0 : index
    %c0_20 = arith.constant 0 : index
    %c0_21 = arith.constant 0 : index
    %52 = vector.load %arg3[%c0_19, %c0_20, %c0_21] : memref<1x24x256xf32, #tpu.memory_space<vmem>>, vector<1x24x128xf32>
    tpu.vector_store %arg3[%c0_19, %c0_20, %c0_21], %49 {strides = array<i32>} : memref<1x24x256xf32, #tpu.memory_space<vmem>>, vector<1x24x128xf32>,
    %c0_22 = arith.constant 0 : index
    %c0_23 = arith.constant 0 : index
    %c128 = arith.constant 128 : index
    %53 = vector.load %arg3[%c0_22, %c0_23, %c128] : memref<1x24x256xf32, #tpu.memory_space<vmem>>, vector<1x24x128xf32>
    tpu.vector_store %arg3[%c0_22, %c0_23, %c128], %51 {strides = array<i32>} : memref<1x24x256xf32, #tpu.memory_space<vmem>>, vector<1x24x128xf32>,
    return
  }
  func.func @transform_0(%arg0: i32) -> (i32, i32, i32) {
    %c0_i32 = arith.constant 0 : i32
    %c0_i32_0 = arith.constant 0 : i32
    %c0_i32_1 = arith.constant 0 : i32
    return %arg0, %c0_i32, %c0_i32_0 : i32, i32, i32
  }
  func.func @transform_1(%arg0: i32) -> (i32, i32, i32) {
    %c0_i32 = arith.constant 0 : i32
    %c0_i32_0 = arith.constant 0 : i32
    %c0_i32_1 = arith.constant 0 : i32
    return %arg0, %c0_i32, %c0_i32_0 : i32, i32, i32
  }
  func.func @transform_2(%arg0: i32) -> (i32, i32, i32) {
    %c0_i32 = arith.constant 0 : i32
    %c0_i32_0 = arith.constant 0 : i32
    %c0_i32_1 = arith.constant 0 : i32
    return %arg0, %c0_i32, %c0_i32_0 : i32, i32, i32
  }
}

</mosaic_0001>

<bundles_post_ra>
// kernel: tpu_custom_call.1
= control target key start
LH: loop header
LB: loop body
LE: loop exit
PB: predicated region body
PF: predicated region fallthrough
CT: control target
= control target key end

     0   :  { %7 = vsyncpa [#allocation3], 0  ;;  %s1195_s0 = inlined_call_operand.hbm [shape: bf16[2,24,128], index: 0, kind: input, shape index: {}]   ;;  %s1196_s1 = inlined_call_operand.hbm [shape: bf16[2,16,128], index: 1, kind: input, shape index: {}]   ;;  %s1197_s2 = inlined_call_operand.hbm [shape: f32[2,24,256], index: 2, kind: output, shape index: {}]  }
   0x1   :  { %9 = vsyncpa [#allocation3 + $0x1], 0 }
   0x2   :  { %10 = vsyncpa [#allocation6], 0 }
   0x3   :  { %12 = vsyncpa [#allocation6 + $0x1], 0 }
   0x4   :  { %13 = vsyncpa [#allocation4], 0 }
   0x5   :  { %15 = vsyncpa [#allocation4 + $0x1], 0  ;;  %s970_s9 = smov 0   ;;  %s972_s10 = smov 0  }
   0x6   :  { %s974_s11 = smov 0   ;;  %s976_s12 = smov 0  }
   0x7 LB: > { %s991_s13 = sadd.s32 4294967295, %s944_s12   ;;  %s665_s14 = sadd.s32 4294967294, %s944_s12   ;;  %s944_s12 = sphi %s976_s12, %s1212_s12   ;;  %s940_s11 = sphi %s974_s11, %s1211_s11   ;;  %s936_s10 = sphi %s972_s10, %s1210_s10   ;;  %s932_s9 = sphi %s970_s9, %s1209_s9  }
   0x8   : > { %s995_s15 = sadd.s32 1, %s944_s12   ;;  %s28_s16 = sadd.s32 1, %s940_s11 }
   0x9   : > { %s25_s17 = ssub.s32 %s944_s12, %s995_s15  ;;  %p35_p0 = scmp.ne.s32.totalorder %s940_s11, %s936_s10 }
   0xa   : > { %p26_p1 = scmp.eq.s32.totalorder %s25_s17, 0  ;;  %p36_p2 = scmp.eq.s32.totalorder %s944_s12, 0 }
   0xb   : > { %p41_p3 = scmp.ne.s32.totalorder %s936_s10, %s932_s9  ;;  %p42_p4 = scmp.eq.s32.totalorder %s991_s13, 0 }
   0xc   : > { %s1007_s18 = scalar_select %p26_p1, %s940_s11, %s28_s16  }
   0xd   : > { %p37_p5 = por %p36_p2, %p35_p0  ;;  %p1009_p6 = por %p42_p4, %p41_p3 }
   0xe   : > { %p91_p7 = scmp.eq.s32.totalorder %s991_s13, 1  ;;  %p97_p8 = scmp.eq.s32.totalorder %s665_s14, 1 }
   0xf   : > { %s1200_s19 = scalar_select %p1009_p6, 1, 0 }
  0x10   : > { %p757_p10 = scmp.lt.s32.totalorder %s944_s12, 2  ;;  %p1016_p11 = por %p91_p7, %p35_p0 }
  0x11   : > { %p1020_p12 = por %p97_p8, %p41_p3  ;;  %s1025_s22 = sand.u32 1, %s940_s11  }
  0x12   : > { %s1201_s20 = scalar_select %p1016_p11, 1, 0 }
  0x13   : > { %s1202_s21 = scalar_select %p1020_p12, 1, 0 }
  0x14   : > { %s736_s23 = smul.u32 192, %s944_s12  ;;  %p1034_p13 = pnand %p757_p10, %p37_p5 }
  0x15   : > { %s735_s24 = smul.u32 12, %s1025_s22  ;;  %s118_s3 = scalar_lea.sflag [#allocation3], %s1025_s22 }
  0x16   : > { %s1032_s27 = scalar_lea.hbm %s1195_s0, %s736_s23  ;;  %p816_p1 = pneg %p1034_p13 }
  0x17   : > { %s121_s29 = scalar_lea.vmem [#allocation2], %s735_s24  ;;  %s814_s4 = scalar_lea.hbm %s1032_s27, 192 }
  0x18   : > { %s128_s30 = sshll.u32 %s121_s29, 4  ;;  %p815_p0 = scmp.ne.s32.totalorder %s1032_s27, %s814_s4  ;;  %s1038_s30 = int_to_ptr.vmem [resolvable:$true] %s128_s30 }
  0x19   : > { %s819_s7 = scalar_lea.hbm %s1195_s0, 384  ;;  %p820_p4 = scmp.lt.u32.totalorder %s1032_s27, %s1195_s0 }
  0x1a   : > { %p817_p2 = pnand %p816_p1, %p815_p0  ;;  %p821_p5 = scmp.lt.u32.totalorder %s819_s7, %s814_s4 }
  0x1b   : > { %p823_p8 = scmp.lt.u32.totalorder %s814_s4, %s1032_s27 }
  0x1c   : > { %p818_p3 = pneg %p817_p2  ;;  %p822_p7 = por %p821_p5, %p820_p4 }
  0x1e   : > { %p824_p10 = por %p823_p8, %p822_p7 }
  0x20   : > { %p825_p9 = pnand %p824_p10, %p818_p3 }
  0x22   : > { %828 = shalt.err (!%p825_p9)
}
  0x23   : > { %s829_s16 = scalar_lea.vmem %s1038_s30, 192  ;;  %s946_s17 = smov [#allocation2]  }
  0x24   : > { %p830_p0 = scmp.ne.s32.totalorder %s1038_s30, %s829_s16  ;;  %s834_s23 = sshll.u32 %s946_s17, 4  ;;  %s835_s23 = int_to_ptr.vmem [resolvable:$false] %s834_s23 }
  0x25   : > { %s836_s24 = scalar_lea.vmem %s835_s23, 384  ;;  %p837_p11 = scmp.lt.s32.totalorder %s1038_s30, %s835_s23 }
  0x26   : > { %p832_p2 = pnand %p830_p0, %p816_p1  ;;  %p838_p4 = scmp.lt.s32.totalorder %s836_s24, %s829_s16 }
  0x28   : > { %p833_p12 = pneg %p832_p2  ;;  %p839_p5 = por %p838_p4, %p837_p11 }
  0x2a   : > { %p840_p7 = pnand %p839_p5, %p833_p12 }
  0x2c   : > { %843 = shalt.err (!%p840_p7)
}
  0x2d   : > { %s947_s25 = smov 64   ;;  %s948_s26 = smov 4  }
  0x2e   : > { %749 = dma.hbm_to_vmem [thread:$0]  (!%p1034_p13), %s1032_s27, 192, %s1038_s30, %s118_s3, %s947_s25, %s947_s25, %s948_s26  }
  0x2f   : > { %p672_p9 = scmp.ge.s32.totalorder %s944_s12, 1  ;;  %p157_p11 = scmp.lt.s32.totalorder %s944_s12, 3 }
  0x30   : > { %s669_s29 = sshll.u32 %s1025_s22, 3  ;;  %s685_s5 = sshll.u32 %s944_s12, 7 }
  0x31   : > { %p1074_p12 = pnand %p672_p9, %p157_p11  ;;  %s142_s6 = scalar_lea.vmem [#allocation5], %s669_s29 }
  0x32   : > { %s149_s7 = sshll.u32 %s142_s6, 4  ;;  %s1082_s16 = scalar_lea.hbm %s1196_s1, %s685_s5  ;;  %s1084_s7 = int_to_ptr.vmem [resolvable:$true] %s149_s7 }
  0x33   : > { %s139_s27 = scalar_lea.sflag [#allocation6], %s1025_s22  ;;  %s844_s30 = scalar_lea.hbm %s1082_s16, 128 }
  0x34   : > { %p845_p3 = scmp.ne.s32.totalorder %s1082_s16, %s844_s30  ;;  %s849_s23 = scalar_lea.hbm %s1196_s1, 256 }
  0x35   : > { %p850_p0 = scmp.lt.u32.totalorder %s1082_s16, %s1196_s1  ;;  %p851_p2 = scmp.lt.u32.totalorder %s849_s23, %s844_s30 }
  0x36   : > { %p847_p8 = pnand %p845_p3, %p816_p1  ;;  %p853_p5 = scmp.lt.u32.totalorder %s844_s30, %s1082_s16 }
  0x37   : > { %p852_p4 = por %p851_p2, %p850_p0 }
  0x38   : > { %p848_p10 = pneg %p847_p8 }
  0x39   : > { %p854_p7 = por %p853_p5, %p852_p4 }
  0x3b   : > { %p855_p9 = pnand %p854_p7, %p848_p10 }
  0x3d   : > { %858 = shalt.err (!%p855_p9)
}
  0x3e   : > { %s859_s5 = scalar_lea.vmem %s1084_s7, 128  ;;  %s949_s6 = smov [#allocation5]  }
  0x3f   : > { %p860_p11 = scmp.ne.s32.totalorder %s1084_s7, %s859_s5  ;;  %s864_s8 = sshll.u32 %s949_s6, 4  ;;  %s865_s8 = int_to_ptr.vmem [resolvable:$false] %s864_s8 }
  0x40   : > { %s866_s14 = scalar_lea.vmem %s865_s8, 256  ;;  %p867_p6 = scmp.lt.s32.totalorder %s1084_s7, %s865_s8 }
  0x41   : > { %p862_p3 = pnand %p860_p11, %p816_p1  ;;  %p868_p0 = scmp.lt.s32.totalorder %s866_s14, %s859_s5 }
  0x43   : > { %p863_p8 = pneg %p862_p3  ;;  %p869_p2 = por %p868_p0, %p867_p6 }
  0x45   : > { %p870_p4 = pnand %p869_p2, %p863_p8 }
  0x47   : > { %873 = shalt.err (!%p870_p4)
}
  0x48   : > { %752 = dma.hbm_to_vmem [thread:$0]  (!%p1034_p13), %s1082_s16, 128, %s1084_s7, %s139_s27, %s947_s25, %s947_s25, %s948_s26  }
  0x49   : > { %161 = sbr.rel (%p1074_p12) target bundleno = 973 (0x3cd), region = 28  ;;  %s1118_s30 = sand.u32 (!%p1074_p12), 1, %s936_s10  }
  0x4a   : > { %s737_s3 = smul.u32 (!%p1074_p12), 12, %s1118_s30  ;;  %s164_s17 = scalar_lea.sflag (!%p1074_p12), [#allocation3], %s1118_s30 }
  0x4b   : > { %p1205_p6 = scmp.ne.s32.totalorder (!%p1074_p12), %s1200_s19, 0 }
  0x4c   : > { %s167_s28 = scalar_lea.vmem (!%p1074_p12), [#allocation2], %s737_s3 }
  0x50   : > { %919 = dma.done.wait (%p1205_p6), %s164_s17, 192  }
  0x51   : > { %921 = vsyncadd (%p1205_p6), %s164_s17, 4294967104  ;;  %s673_s22 = sshll.u32 %s1118_s30, 3  ;;  %s173_s25 = scalar_lea.sflag [#allocation6], %s1118_s30 }
  0x52   : > { %s176_s26 = scalar_lea.vmem [#allocation5], %s673_s22 }
  0x53   : > { %923 = dma.done.wait (%p1205_p6), %s173_s25, 128  }
  0x54   : > { %925 = vsyncadd (%p1205_p6), %s173_s25, 4294967168  ;;  %v950_v0 = vmov 0.0   ;;  %vm951_vm0 = vmmov 0   ;;  %v797_v1 = vld [vmem:[%s167_s28] sm:$0xff]   ;;  %v799_v2 = vld [vmem:[%s176_s26] sm:$0xff]   ;;  %v313_v4 = vlaneseq  ;;  %vm336_vm3 = vcmask 195584  }
  0x55   : > { %701 = vmatprep.subr.bf16.mxu0 %v950_v0  ;;  %705 = vmatprep.mubr.msk.bf16.mxu0 %vm951_vm0, %v950_v0  ;;  %v798_v3 = vld [vmem:[%s167_s28 + $0x8] ss:$0 sps:$4 sm:$0xff]   ;;  %vm401_vm5 = vcmask 1043456   ;;  %vm375_vm9 = vcmask 130048   ;;  %s738_s19 = smul.u32 48, %s1118_s30  ;;  %s556_s29 = scalar_lea.sflag [#allocation4], %s1118_s30 }
  0x56   : > { %702 = vmatpush3.bf16.xpose.msra.mxu0 %v797_v1  ;;  %711 = vmatprep.mubr.bf16.mxu1 %v797_v1  ;;  %v314_v5 = vshrl.u32 %v313_v4, 7  ;;  %v317_v6 = vand.u32 127, %v313_v4  ;;  %v403_v20 = vsel %vm401_vm5, %v798_v3, 0  ;;  %s739_s16 = smul.u32 768, %s991_s13  ;;  %p1206_p1 = scmp.ne.s32.totalorder %s1201_s20, 0 }
  0x57   : > { %703 = vmatprep.subr.bf16.mxu0 %v950_v0  ;;  %709 = vmatprep.subr.bf16.mxu1 %v799_v2  ;;  %s201_s4 = scalar_lea.vmem [#allocation7], %s738_s19  ;;  %s952_s13 = smov [#allocation7]  }
  0x58   : > { %710 = vmatpush3.bf16.xpose.msra.mxu1 %v799_v2  ;;  %v315_v7 = vadd.s32 8, %v314_v5  ;;  %vm320_vm1 = vcmp.lt.s32.totalorder %v317_v6, 17  ;;  %v325_v24 = vadd.s32 16, %v314_v5  ;;  %vm329_vm7 = vcmp.lt.s32.totalorder %v317_v6, 9  ;;  %s569_s7 = sshll.u32 %s201_s4, 4  ;;  %s1151_s24 = scalar_lea.hbm %s1197_s2, %s739_s16  ;;  %s1146_s7 = int_to_ptr.vmem [resolvable:$true] %s569_s7 }
  0x59   : > { %715 = vmatprep.subr.bf16.mxu1 %v950_v0  ;;  %s874_s5 = scalar_lea.vmem %s1146_s7, 768  ;;  %s878_s6 = sshll.u32 %s952_s13, 4  ;;  %s879_s6 = int_to_ptr.vmem [resolvable:$false] %s878_s6 }
  0x5a   : > { %vm319_vm2 = vcmp.lt.s32.totalorder %v315_v7, 9  ;;  %vm328_vm6 = vcmp.lt.s32.totalorder %v325_v24, 17  ;;  %p875_p13 = scmp.ne.s32.totalorder %s1146_s7, %s874_s5  ;;  %s880_s8 = scalar_lea.vmem %s879_s6, 1536 }
  0x5b   : > { %vm322_vm4 = vmand %vm319_vm2, %vm320_vm1  ;;  %p881_p5 = scmp.lt.s32.totalorder %s1146_s7, %s879_s6  ;;  %p882_p7 = scmp.lt.s32.totalorder %s880_s8, %s874_s5 }
  0x5c   : > { %vm332_vm8 = vmand %vm328_vm6, %vm329_vm7  ;;  %p876_p12 = pnand %p875_p13, %p1206_p1 }
  0x5d   : > { %p883_p9 = por %p882_p7, %p881_p5 }
  0x5e   : > { %704 = vmatpush3.bf16.xpose.msra.mxu0 %v798_v3  ;;  %p877_p10 = pneg %p876_p12 }
  0x5f   : > { %723 = vmatprep.subr.bf16.mxu0 %v799_v2  ;;  %712 = vmatmul.mubr.bf16.vlgmr.msra.gmra.mrb[0].mxu1 %v798_v3 }
  0x60   : > { %716 = vmatpush3.bf16.msra.mxu1 %v797_v1  ;;  %719 = vmatprep.mubr.msk.bf16.mxu1 %vm951_vm0, %v950_v0  ;;  %p884_p11 = pnand %p883_p9, %p877_p10 }
  0x61   : > { %717 = vmatprep.subr.bf16.mxu1 %v950_v0 }
  0x64   : > { %718 = vmatpush3.bf16.msra.mxu1 %v403_v20 }
  0x65   : > { %706 = vmatmul.mubr.bf16.vlgmr.msra.gmra.mrb[0].mxu0 %v799_v2 }
  0x66   : > { %724 = vmatpush3.bf16.msra.mxu0 %v799_v2 }
 0x132   : > { %v713_v16 = vpop.f32.mrb[0].mxu1 }
 0x133   : > { %v299_v17 = vpop.f32.mrb[1].mxu1  ;;  %v335_v30 = vsel %vm332_vm8, %v713_v16, -1e+30 }
 0x134   : > { %v714_v18 = vpop.f32.mrb[2].mxu1  ;;  %v333_v31 = vsel %vm329_vm7, %v299_v17, -1e+30 }
 0x135   : > { %v302_v19 = vpop.f32.mrb[3].mxu1 }
 0x136   : > { %v334_v33 = vsel %vm329_vm7, %v302_v19, -1e+30 }
 0x138   : > { %v258_v8 = vpop.f32.mrb[0].mxu0 }
 0x139   : > { %v323_v9 = vsel %vm320_vm1, %v258_v8, -1e+30  ;;  %v707_v10 = vpop.f32.mrb[1].mxu0 }
 0x13a   : > { %v261_v11 = vpop.f32.mrb[2].mxu0  ;;  %v337_v12 = vsel %vm336_vm3, %v323_v9, -inf }
 0x13b   : > { %v324_v13 = vsel %vm322_vm4, %v261_v11, -1e+30  ;;  %338 = vmax.xlane.f32.xlu0 %v337_v12  ;;  %v708_v14 = vpop.f32.mrb[3].mxu0 }
 0x13c   : > { %v340_v15 = vsel %vm336_vm3, %v324_v13, -inf }
 0x13f   : > { %341 = vmax.xlane.f32.xlu0 %v340_v15 }
 0x1c8   : > { %v339_v21 = vpop.xlane.xlu0 %338 }
 0x1cc   : > { %v342_v22 = vpop.xlane.xlu0 %341 }
 0x1cd   : > { %v343_v23 = vmax.f32 %v339_v21, %v342_v22 }
 0x1cf   : > { %v344_v25 = vrot.slane %v343_v23, 4 }
 0x1d1   : > { %v345_v26 = vmax.f32 %v343_v23, %v344_v25 }
 0x1d3   : > { %v346_v27 = vrot.slane %v345_v26, 2 }
 0x1d5   : > { %v347_v28 = vmax.f32 %v345_v26, %v346_v27 }
 0x1d7   : > { %v348_v29 = vrot.slane %v347_v28, 1 }
 0x1d9   : > { %v349_v32 = vmax.f32 %v347_v28, %v348_v29 }
 0x1db   : > { %v350_v34 = vsub.f32 %v323_v9, %v349_v32  ;;  %v351_v35 = vsub.f32 %v324_v13, %v349_v32  ;;  %v358_v36 = vsub.f32 %v335_v30, %v349_v32  ;;  %v356_v37 = vsub.f32 %v333_v31, %v349_v32 }
 0x1dc   : > { %v357_v38 = vsub.f32 %v334_v33, %v349_v32 }
 0x1dd   : > { %v352_v39 = vmul.f32 1.442695, %v350_v34  ;;  %v354_v40 = vmul.f32 1.442695, %v351_v35  ;;  %v363_v41 = vmul.f32 1.442695, %v358_v36 }
 0x1de   : > { %v359_v42 = vmul.f32 1.442695, %v356_v37  ;;  %v361_v43 = vmul.f32 1.442695, %v357_v38 }
 0x1df   : > { %800 = vpow2.f32 %v352_v39 }
 0x1e0   : > { %802 = vpow2.f32 %v354_v40 }
 0x1e1   : > { %804 = vpow2.f32 %v363_v41 }
 0x1e2   : > { %806 = vpow2.f32 %v359_v42 }
 0x1e3   : > { %808 = vpow2.f32 %v361_v43 }
 0x1e9   : > { %v801_v44 = vpop.eup %800 }
 0x1ea   : > { %v803_v45 = vpop.eup %802  ;;  %v365_v46 = vsel %vm336_vm3, %v801_v44, 0.0 }
 0x1eb   : > { %v805_v47 = vpop.eup %804  ;;  %v366_v48 = vsel %vm336_vm3, %v803_v45, 0.0 }
 0x1ec   : > { %v807_v49 = vpop.eup %806  ;;  %v367_v50 = vadd.f32 %v366_v48, %v365_v46  ;;  %v379_v57 = vsel %vm375_vm9, %v805_v47, 0.0 }
 0x1ed   : > { %v809_v51 = vpop.eup %808  ;;  %v376_v52 = vsel %vm375_vm9, %v807_v49, 0.0 }
 0x1ee   : > { %v368_v53 = vrot.slane %v367_v50, 4  ;;  %v377_v54 = vsel %vm375_vm9, %v809_v51, 0.0 }
 0x1ef   : > { %v378_v55 = vadd.f32 %v377_v54, %v376_v52 }
 0x1f0   : > { %v369_v56 = vadd.f32 %v368_v53, %v367_v50 }
 0x1f1   : > { %v380_v58 = vadd.f32 %v379_v57, %v378_v55 }
 0x1f2   : > { %v370_v59 = vrot.slane %v369_v56, 2 }
 0x1f3   : > { %v381_v60 = vrot.slane %v380_v58, 4 }
 0x1f4   : > { %v371_v61 = vadd.f32 %v370_v59, %v369_v56 }
 0x1f5   : > { %v382_v62 = vadd.f32 %v381_v60, %v380_v58 }
 0x1f6   : > { %v372_v63 = vrot.slane %v371_v61, 1 }
 0x1f7   : > { %v383_v0 = vrot.slane %v382_v62, 2 }
 0x1f8   : > { %v373_v1 = vadd.f32 %v372_v63, %v371_v61 }
 0x1f9   : > { %v384_v2 = vadd.f32 %v383_v0, %v382_v62 }
 0x1fa   : > { %v374_v3 = vmax.f32 %v373_v1, 1e-30 }
 0x1fb   : > { %v385_v4 = vrot.slane %v384_v2, 1 }
 0x1fc   : > { %810 = vrcp.f32 %v374_v3 }
 0x1fd   : > { %v386_v5 = vadd.f32 %v385_v4, %v384_v2 }
 0x1ff   : > { %v387_v6 = vmax.f32 %v386_v5, 1e-30 }
 0x201   : > { %812 = vrcp.f32 %v387_v6 }
 0x206   : > { %v811_v7 = vpop.eup %810 }
 0x207   : > { %v389_v8 = vmul.f32 %v811_v7, %v801_v44  ;;  %v390_v9 = vmul.f32 %v811_v7, %v803_v45 }
 0x209   : > { %v391_v10 = vpack.c.bf16 %v390_v9, %v389_v8 }
 0x20b   : > { %v813_v11 = vpop.eup %812  ;;  %720 = vmatmul.mubr.msk.bf16.vlgmr.msra.gmra.mrb[4].mxu1 %vm336_vm3, %v391_v10 }
 0x20c   : > { %v393_v12 = vmul.f32 %v813_v11, %v807_v49  ;;  %v394_v13 = vmul.f32 %v813_v11, %v809_v51  ;;  %v395_v14 = vmul.f32 %v813_v11, %v805_v47 }
 0x20e   : > { %v396_v15 = vpack.c.bf16 %v394_v13, %v393_v12  ;;  %v397_v16 = vpack.c.bf16 %v395_v14, %v395_v14 }
 0x210   : > { %725 = vmatprep.mubr.msk.bf16.mxu0 %vm375_vm9, %v396_v15  ;;  %731 = vmatprep.mubr.msk.bf16.mxu1 %vm375_vm9, %v396_v15 }
 0x211   : > { %726 = vmatmul.mubr.msk.bf16.vlgmr.msra.gmra.mrb[4].mxu0 %vm375_vm9, %v397_v16 }
 0x2de   : > { %v439_v17 = vpop.f32.mrb[4].mxu1 }
 0x2df   : > { %v721_v18 = vpop.f32.mrb[5].mxu1 }
 0x2e0   : > { %v442_v19 = vpop.f32.mrb[6].mxu1 }
 0x2e1   : > { %v500_v20 = vpack.c.bf16 %v442_v19, %v439_v17  ;;  %v722_v21 = vpop.f32.mrb[7].mxu1 }
 0x2e3   : > { %729 = vmatprep.subr.bf16.mxu1 %v500_v20 }
 0x2e4   : > { %v727_v22 = vpop.f32.mrb[4].mxu0  ;;  %730 = vmatpush3.bf16.msra.mxu1 %v500_v20 }
 0x2e5   : > { %551 = vst [vmem:[%s201_s4 + $0x20] sm:$0xff] %v727_v22  ;;  %v486_v23 = vpop.f32.mrb[5].mxu0 }
 0x2e6   : > { %549 = vst [vmem:[%s201_s4] sm:$0xff] %v486_v23  ;;  %v728_v24 = vpop.f32.mrb[6].mxu0 }
 0x2e7   : > { %v489_v25 = vpop.f32.mrb[7].mxu0  ;;  %732 = vmatmul.mubr.msk.bf16.vlgmr.msra.gmra.mrb[8].mxu1 %vm375_vm9, %v397_v16 }
 0x2e8   : > { %550 = vst [vmem:[%s201_s4 + $0x10] sm:$0xff] %v489_v25 }
 0x3ba   : > { %v733_v26 = vpop.f32.mrb[8].mxu1 }
 0x3bb   : > { %554 = vst [vmem:[%s201_s4 + $0x28] sm:$0xff] %v733_v26  ;;  %v535_v27 = vpop.f32.mrb[9].mxu1 }
 0x3bc   : > { %552 = vst [vmem:[%s201_s4 + $0x8] sm:$0xff] %v535_v27  ;;  %v734_v28 = vpop.f32.mrb[10].mxu1 }
 0x3bd   : > { %v538_v29 = vpop.f32.mrb[11].mxu1 }
 0x3be   : > { %553 = vst [vmem:[%s201_s4 + $0x18] sm:$0xff] %v538_v29 }
 0x3bf   : > { %887 = shalt.err (!%p884_p11)
}
 0x3c0   : > { %s888_s14 = scalar_lea.hbm %s1151_s24, 768  ;;  %s892_s28 = scalar_lea.hbm %s1197_s2, 1536 }
 0x3c1   : > { %p889_p3 = scmp.ne.s32.totalorder %s1151_s24, %s888_s14  ;;  %p893_p2 = scmp.lt.u32.totalorder %s1151_s24, %s1197_s2 }
 0x3c2   : > { %p894_p4 = scmp.lt.u32.totalorder %s892_s28, %s888_s14  ;;  %p896_p13 = scmp.lt.u32.totalorder %s888_s14, %s1151_s24 }
 0x3c3   : > { %p890_p8 = pnand %p889_p3, %p1206_p1 }
 0x3c4   : > { %p895_p6 = por %p894_p4, %p893_p2 }
 0x3c5   : > { %p891_p0 = pneg %p890_p8 }
 0x3c6   : > { %p897_p12 = por %p896_p13, %p895_p6 }
 0x3c8   : > { %p898_p10 = pnand %p897_p12, %p891_p0 }
 0x3ca   : > { %901 = shalt.err (!%p898_p10)
}
 0x3cb   : > { %s953_s26 = smov 256   ;;  %s954_s19 = smov 16  }
 0x3cc   : > { %744 = dma.vmem_to_hbm [thread:$0]  (%p1206_p1), %s1146_s7, 768, %s1151_s24, %s556_s29, %s953_s26, %s953_s26, %s954_s19  }
 0x3cd PF: > { %s584_s4 = sand.u32 1, %s932_s9   ;;  %p1207_p5 = scmp.ne.s32.totalorder %s1202_s21, 0 }
 0x3ce   : > { %p1208_p7 = scmp.ge.s32.totalorder %s944_s12, 2  ;;  %s585_s16 = scalar_lea.sflag [#allocation4], %s584_s4 }
 0x3d0   : > { %p754_p9 = pnand %p1208_p7, %p1207_p5 }
 0x3d2   : > { %927 = dma.done.wait (!%p754_p9), %s585_s16, 768  }
 0x3d3   : > { %929 = vsyncadd (!%p754_p9), %s585_s16, 4294966528  ;;  %p18_p11 = scmp.ge.s32.totalorder %s995_s15, 4   ;;  %s1209_s9 = smov %s936_s10 }
 0x3d4   : > { %s1210_s10 = smov %s940_s11  ;;  %s1211_s11 = smov %s1007_s18 }
 0x3d5   : > { %s1212_s12 = smov %s995_s15  ;;  %20 = sbr.rel (!%p18_p11) target bundleno = 7 (0x7), region = 86 }
 0x3dc   :  { %590 = vsyncpa [#allocation3], 1 }
 0x3dd   :  { %592 = vsyncpa [#allocation3 + $0x1], 1 }
 0x3de   :  { %593 = vsyncpa [#allocation6], 1 }
 0x3df   :  { %595 = vsyncpa [#allocation6 + $0x1], 1 }
 0x3e0   :  { %596 = vsyncpa [#allocation4], 1 }
 0x3e1   :  { %598 = vsyncpa [#allocation4 + $0x1], 1 }

</bundles_post_ra>
